<compile_context>
chip_gen: v5e
topology: v5e:2x2
jax: 0.10.0
libtpu: 0.0.40
codegen_flags: <defaults>
</compile_context>

<pallas_src>
import functools

import jax
import jax.numpy as jnp
from jax import lax
from jax.experimental import pallas as pl
from jax.experimental.pallas import tpu as pltpu

_LANES = 128
_SUBLANES = 8


def _round_up(v, m):
    return -(-v // m) * m


def _sse_kernel(x_ref, t_ref, out_ref, acc_ref, *, block_rows, rows_total, need_mask):
    """Accumulate per-lane partial sums of (x - t)^2 over the inner grid axis."""
    i = pl.program_id(1)

    @pl.when(i == 0)
    def _():
        acc_ref[...] = jnp.zeros_like(acc_ref)

    d = x_ref[...].astype(jnp.float32) - t_ref[...].astype(jnp.float32)
    d2 = d * d

    if need_mask:
        # Last block may extend past the valid rows; Pallas does not guarantee
        # zeros there, so mask by global row index (static rows_total).
        blk = pl.program_id(0) * pl.num_programs(1) + i
        row0 = blk * block_rows
        rid = lax.broadcasted_iota(jnp.int32, (block_rows, _LANES), 0)
        d2 = jnp.where((row0 + rid) < rows_total, d2, 0.0)

    # (block_rows, 128) -> (8, 128) per-lane partials: pure VPU adds, no XLU /
    # scalar chain in the steady-state loop.
    acc_ref[...] += jnp.sum(
        d2.reshape(block_rows // _SUBLANES, _SUBLANES, _LANES), axis=0
    )

    @pl.when(i == pl.num_programs(1) - 1)
    def _():
        out_ref[...] = acc_ref[...]


def content_loss_forward(x, target, *, block_rows=1024):
    """Returns (input_passthrough, mse_loss) matching ContentLoss.forward."""
    assert x.shape == target.shape, "input / target shape mismatch"
    n = x.size

    xf = x.reshape(-1)
    tf = target.reshape(-1)

    rows = -(-n // _LANES)
    pad = rows * _LANES - n
    if pad:
        # TODO(synk): ragged lane tail (n % 128 != 0) still materializes a
        # zero-pad copy of both inputs; rare for conv feature maps.
        xf = jnp.pad(xf, (0, pad))
        tf = jnp.pad(tf, (0, pad))
    xr = xf.reshape(rows, _LANES)  # free view when pad == 0 (no dtype upcast)
    tr = tf.reshape(rows, _LANES)

    # Row-block size: large (~512 KiB/input block) but clamped to the data size;
    # must stay a multiple of 8 sublanes.  2 inputs x 2 buffers x 512 KiB = 2 MiB
    # of VMEM -> comfortably under the scoped default on v5e/v6e/v7x.
    blk = max(_SUBLANES, min(block_rows, _round_up(rows, _SUBLANES)))
    blk = _round_up(blk, _SUBLANES)

    nblocks = -(-rows // blk)
    need_mask = (rows % blk) != 0

    # Leading "parallel" axis: lets v7x shard the streaming reduction across its
    # two TensorCores.  Only used when the block count splits evenly; otherwise
    # fall back to a single sequential stream (still correct everywhere).
    nparts = 2 if (nblocks >= 2 and nblocks % 2 == 0) else 1
    steps = nblocks // nparts

    kernel = functools.partial(
        _sse_kernel, block_rows=blk, rows_total=rows, need_mask=need_mask
    )

    sse_partials = pl.pallas_call(
        kernel,
        out_shape=jax.ShapeDtypeStruct((nparts * _SUBLANES, _LANES), jnp.float32),
        grid_spec=pltpu.PrefetchScalarGridSpec(
            num_scalar_prefetch=0,
            grid=(nparts, steps),
            in_specs=[
                pl.BlockSpec((blk, _LANES), lambda p, i: (p * steps + i, 0)),
                pl.BlockSpec((blk, _LANES), lambda p, i: (p * steps + i, 0)),
            ],
            out_specs=pl.BlockSpec((_SUBLANES, _LANES), lambda p, i: (p, 0)),
            scratch_shapes=[pltpu.VMEM((_SUBLANES, _LANES), jnp.float32)],
        ),
        compiler_params=pltpu.CompilerParams(
            dimension_semantics=("parallel", "arbitrary"),
        ),
    )(xr, tr)

    loss = jnp.sum(sse_partials) / jnp.float32(n)
    # TODO(synk): PyTorch stores the loss on the module (self.loss) as a side
    # effect; here it is returned alongside the passthrough input instead.
    return x, loss


if __name__ == "__main__":
    key = jax.random.PRNGKey(0)
    kx, kt = jax.random.split(key)

    # NCHW, small shapes: batch=2, channels=4, spatial=16x16
    x = jax.random.normal(kx, (2, 4, 16, 16), dtype=jnp.float32)
    target = jax.random.normal(kt, (2, 4, 16, 16), dtype=jnp.float32)  # target.detach()

    out, loss = content_loss_forward(x, target)
    out = jax.block_until_ready(out)
    loss = jax.block_until_ready(loss)

    # Reference check (plain JAX) mirroring F.mse_loss default 'mean' reduction.
    ref_loss = jnp.mean((x - target) ** 2)
    assert jnp.allclose(loss, ref_loss, rtol=1e-5, atol=1e-6), (loss, ref_loss)
    assert jnp.array_equal(out, x)  # forward returns input unchanged

    print("KERNEL_OK")
</pallas_src>

<mosaic_0001>
module attributes {stable_mosaic.version = 11 : i64} {
  func.func @_sse_kernel(%arg0: i32, %arg1: i32, %arg2: memref<16x128xf32, #tpu.memory_space<vmem>>, %arg3: memref<16x128xf32, #tpu.memory_space<vmem>>, %arg4: memref<8x128xf32, #tpu.memory_space<vmem>>, %arg5: memref<8x128xf32, #tpu.memory_space<vmem>>) attributes {dimension_semantics = [#tpu.dimension_semantics<parallel>, #tpu.dimension_semantics<arbitrary>], iteration_bounds = array<i64: 1, 1>, scalar_prefetch = 0 : i64, scratch_operands = 1 : i64, tpu.core_type = #tpu.core_type<tc>, window_params = [{transform_indices = @transform_0, window_bounds = array<i64: 16, 128>}, {transform_indices = @transform_1, window_bounds = array<i64: 16, 128>}, {transform_indices = @transform_2, window_bounds = array<i64: 8, 128>}]} {
    %c0_i32 = arith.constant 0 : i32
    %0 = arith.cmpi eq, %arg1, %c0_i32 : i32
    %1 = arith.extui %0 : i1 to i32
    %c0_i32_0 = arith.constant 0 : i32
    %2 = arith.cmpi ne, %1, %c0_i32_0 : i32
    scf.if %2 {
      %cst_10 = arith.constant 0.000000e+00 : f32
      %15 = vector.broadcast %cst_10 : f32 to vector<8x128xf32>
      %c0_11 = arith.constant 0 : index
      %c0_12 = arith.constant 0 : index
      %16 = vector.load %arg5[%c0_11, %c0_12] : memref<8x128xf32, #tpu.memory_space<vmem>>, vector<8x128xf32>
      tpu.vector_store %arg5[%c0_11, %c0_12], %15 {strides = array<i32>} : memref<8x128xf32, #tpu.memory_space<vmem>>, vector<8x128xf32>,
    } else {
    }
    %c0 = arith.constant 0 : index
    %c0_1 = arith.constant 0 : index
    %3 = vector.load %arg2[%c0, %c0_1] : memref<16x128xf32, #tpu.memory_space<vmem>>, vector<16x128xf32>
    %c0_2 = arith.constant 0 : index
    %c0_3 = arith.constant 0 : index
    %4 = vector.load %arg3[%c0_2, %c0_3] : memref<16x128xf32, #tpu.memory_space<vmem>>, vector<16x128xf32>
    %5 = arith.subf %3, %4 : vector<16x128xf32>
    %6 = arith.mulf %5, %5 : vector<16x128xf32>
    %c0_4 = arith.constant 0 : index
    %c0_5 = arith.constant 0 : index
    %7 = vector.load %arg5[%c0_4, %c0_5] : memref<8x128xf32, #tpu.memory_space<vmem>>, vector<8x128xf32>
    %8 = vector.shape_cast %6 : vector<16x128xf32> to vector<2x8x128xf32>
    %cst = arith.constant dense<0.000000e+00> : vector<8x128xf32>
    %9 = vector.multi_reduction <add>, %8, %cst [0] : vector<2x8x128xf32> to vector<8x128xf32>
    %10 = arith.addf %7, %9 : vector<8x128xf32>
    %c0_6 = arith.constant 0 : index
    %c0_7 = arith.constant 0 : index
    %11 = vector.load %arg5[%c0_6, %c0_7] : memref<8x128xf32, #tpu.memory_space<vmem>>, vector<8x128xf32>
    tpu.vector_store %arg5[%c0_6, %c0_7], %10 {strides = array<i32>} : memref<8x128xf32, #tpu.memory_space<vmem>>, vector<8x128xf32>,
    %c0_i32_8 = arith.constant 0 : i32
    %12 = arith.cmpi eq, %arg1, %c0_i32_8 : i32
    %13 = arith.extui %12 : i1 to i32
    %c0_i32_9 = arith.constant 0 : i32
    %14 = arith.cmpi ne, %13, %c0_i32_9 : i32
    scf.if %14 {
      %c0_10 = arith.constant 0 : index
      %c0_11 = arith.constant 0 : index
      %15 = vector.load %arg5[%c0_10, %c0_11] : memref<8x128xf32, #tpu.memory_space<vmem>>, vector<8x128xf32>
      %c0_12 = arith.constant 0 : index
      %c0_13 = arith.constant 0 : index
      %16 = vector.load %arg4[%c0_12, %c0_13] : memref<8x128xf32, #tpu.memory_space<vmem>>, vector<8x128xf32>
      tpu.vector_store %arg4[%c0_12, %c0_13], %15 {strides = array<i32>} : memref<8x128xf32, #tpu.memory_space<vmem>>, vector<8x128xf32>,
    } else {
    }
    return
  }
  func.func @transform_0(%arg0: i32, %arg1: i32) -> (i32, i32) {
    %c1_i32 = arith.constant 1 : i32
    %0 = arith.muli %arg0, %c1_i32 : i32
    %1 = arith.addi %0, %arg1 : i32
    %c0_i32 = arith.constant 0 : i32
    %c0_i32_0 = arith.constant 0 : i32
    return %1, %c0_i32 : i32, i32
  }
  func.func @transform_1(%arg0: i32, %arg1: i32) -> (i32, i32) {
    %c1_i32 = arith.constant 1 : i32
    %0 = arith.muli %arg0, %c1_i32 : i32
    %1 = arith.addi %0, %arg1 : i32
    %c0_i32 = arith.constant 0 : i32
    %c0_i32_0 = arith.constant 0 : i32
    return %1, %c0_i32 : i32, i32
  }
  func.func @transform_2(%arg0: i32, %arg1: i32) -> (i32, i32) {
    %c0_i32 = arith.constant 0 : i32
    %c0_i32_0 = arith.constant 0 : i32
    return %arg0, %c0_i32 : i32, i32
  }
}

</mosaic_0001>

<bundles_post_ra>
// kernel: tpu_custom_call.1
= control target key start
LH: loop header
LB: loop body
LE: loop exit
PB: predicated region body
PF: predicated region fallthrough
CT: control target
= control target key end

     0   :  { %7 = vsyncpa [#allocation4], 0  ;;  %s208_s0 = inlined_call_operand.hbm [shape: f32[16,128], index: 0, kind: input, shape index: {}]   ;;  %s209_s1 = inlined_call_operand.hbm [shape: f32[16,128], index: 1, kind: input, shape index: {}]   ;;  %s210_s2 = inlined_call_operand.hbm [shape: f32[8,128], index: 2, kind: output, shape index: {}]  }
   0x1   :  { %8 = vsyncpa [#allocation7], 0 }
   0x2   :  { %9 = vsyncpa [#allocation5], 0  ;;  %s18_s11 = sshll.u32 %s208_s0, 4  ;;  %s179_s12 = smov [#allocation3]   ;;  %s19_s11 = int_to_ptr.hbm [resolvable:$true] %s18_s11 }
   0x3   :  { %s20_s13 = sshll.u32 %s179_s12, 4  ;;  %s35_s16 = sshll.u32 %s209_s1, 4  ;;  %s21_s13 = int_to_ptr.vmem [resolvable:$true] %s20_s13  ;;  %s36_s16 = int_to_ptr.hbm [resolvable:$true] %s35_s16 }
   0x4   :  { %s180_s17 = smov 128   ;;  %s181_s18 = smov 8  }
   0x5   :  { %26 = dma.hbm_to_vmem [thread:$0]  %s19_s11, 256, %s21_s13, [#allocation4], %s180_s17, %s180_s17, %s181_s18  }
   0x6   :  { %s182_s19 = smov [#allocation6]  }
   0x7   :  { %s37_s20 = sshll.u32 %s182_s19, 4  ;;  %s38_s20 = int_to_ptr.vmem [resolvable:$true] %s37_s20 }
   0x8   :  { %43 = dma.hbm_to_vmem [thread:$0]  %s36_s16, 256, %s38_s20, [#allocation7], %s180_s17, %s180_s17, %s181_s18  }
   0x9   :  { %173 = dma.done.wait [#allocation4], 256  }
   0xa   :  { %174 = vsyncadd [#allocation4], 4294967040 }
   0xb   :  { %175 = dma.done.wait [#allocation7], 256  }
   0xc   :  { %176 = vsyncadd [#allocation7], 4294967040  ;;  %v61_v0 = vld [vmem:[#allocation3] sm:$0xff]  ;;  %v62_v1 = vld [vmem:[#allocation3 + $0x8] sm:$0xff]  ;;  %s183_s0 = smov [#allocation8]   ;;  %s85_s23 = sshll.u32 %s210_s2, 4  ;;  %s86_s23 = int_to_ptr.hbm [resolvable:$true] %s85_s23 }
   0xd   :  { %v63_v2 = vld [vmem:[#allocation6] sm:$0xff]  ;;  %v64_v3 = vld [vmem:[#allocation6 + $0x8] sm:$0xff]  ;;  %s83_s1 = sshll.u32 %s183_s0, 4  ;;  %s84_s1 = int_to_ptr.vmem [resolvable:$true] %s83_s1 }
   0xe   :  { %v65_v4 = vsub.f32 %v61_v0, %v63_v2  ;;  %v66_v5 = vsub.f32 %v62_v1, %v64_v3 }
  0x10   :  { %v67_v6 = vmul.f32 %v65_v4, %v65_v4  ;;  %v68_v7 = vmul.f32 %v66_v5, %v66_v5 }
  0x12   :  { %v70_v8 = vadd.f32 %v68_v7, %v67_v6 }
  0x14   :  { %77 = vst [vmem:[#allocation8] sm:$0xff] %v70_v8 }
  0x15   :  { %88 = dma.vmem_to_hbm [thread:$0]  %s84_s1, 128, %s86_s23, [#allocation5]  }
  0x16   :  { %177 = dma.done.wait [#allocation5], 128  }
  0x17   :  { %178 = vsyncadd [#allocation5], 4294967168 }
  0x18   :  { %93 = vsyncpa [#allocation4], 1 }
  0x19   :  { %94 = vsyncpa [#allocation7], 1 }
  0x1a   :  { %95 = vsyncpa [#allocation5], 1 }

</bundles_post_ra>
